<compile_context>
chip_gen: v7x
topology: tpu7x:2x2x1
jax: 0.10.0
libtpu: 0.0.40
codegen_flags: <defaults>
</compile_context>

<pallas_src>
import math
from functools import partial

import jax
import jax.numpy as jnp
from jax.experimental import pallas as pl
from jax.experimental.pallas import tpu as pltpu

SHIFT = math.log(2.0)      # ShiftedSoftplus shift
MIN_VAL = 1e-06            # LinearNormalGamma min_val


def _round_up(x, m):
    return (x + m - 1) // m * m


def _block_diag(mat, fold):
    """[in, out] -> [fold*in, fold*out] block-diagonal.  One-time (load-time) cost."""
    i, o = mat.shape
    eye = jnp.eye(fold, dtype=mat.dtype)
    return (eye[:, None, :, None] * mat[None, :, None, :]).reshape(fold * i, fold * o)


def _pick_tile_rows(n_rows, bytes_per_row, *, target_bytes, min_rows):
    """Folded-rows per grid step: ~target_bytes of v per step, but keep >= 2 grid
    steps when possible so v7x's two TensorCores both get work."""
    if n_rows <= min_rows:
        return n_rows                                   # single full-extent block
    tn = max(min_rows, target_bytes // max(bytes_per_row, 1))
    tn = min(tn, _round_up(pl.cdiv(n_rows, 2), min_rows))   # >= 2 steps (megacore)
    tn = min(tn, _round_up(n_rows, min_rows))
    return _round_up(tn, min_rows)


def _vmem_limit_bytes(buffer_bytes, slack=4 << 20):
    """Actual footprint (Pallas double-buffers every auto-pipelined operand)."""
    total = 2 * sum(int(b) for b in buffer_bytes) + slack
    return int(min(max(total, 8 << 20), 64 << 20))


# ---------------------------------------------------------------------------
# Kernels (run once per folded-N tile; everything fused, f32 accumulation)
# ---------------------------------------------------------------------------
def _uhead_false_kernel(v_ref, w1_ref, b1_ref, w2_ref, b2_ref, o_ref):
    # lin1 (MXU) + ShiftedSoftplus (EUP/VPU), block-diagonal folded weights
    h = jnp.dot(v_ref[...], w1_ref[...], preferred_element_type=jnp.float32)
    h = jax.nn.softplus(h + b1_ref[...]) - SHIFT
    # lin2 (MXU)
    o = jnp.dot(h.astype(w2_ref.dtype), w2_ref[...],
                preferred_element_type=jnp.float32) + b2_ref[...]
    o_ref[...] = o.astype(o_ref.dtype)


def _uhead_evidential_kernel(v_ref, w1_ref, b1_ref, w2_ref, b2_ref,
                             mask_ref, off_ref, o_ref):
    # lin1 + ShiftedSoftplus
    h = jnp.dot(v_ref[...], w1_ref[...], preferred_element_type=jnp.float32)
    h = jax.nn.softplus(h + b1_ref[...]) - SHIFT
    # LinearNormalGamma linear; columns grouped per fold-block as [mu | v | alpha | beta]
    raw = jnp.dot(h.astype(w2_ref.dtype), w2_ref[...],
                  preferred_element_type=jnp.float32) + b2_ref[...]
    # Epilogue on the whole lane-dense slab: mu columns pass through, the rest get
    # softplus(.) + per-column offset (eps, eps+1, eps).  Single vsel per element.
    transformed = jax.nn.softplus(raw) + off_ref[...]
    o_ref[...] = jnp.where(mask_ref[...] > 0.5, raw, transformed).astype(o_ref.dtype)


# ---------------------------------------------------------------------------
# One-time parameter preprocessing (model-load time, NOT per call)
# ---------------------------------------------------------------------------
def prepare_uncertainty_false_params(w1, b1, w2, b2, fold=None,
                                     param_dtype=jnp.float32):
    """w1:[H2,H] b1:[H2] w2:[P,H2] b2:[P]  (PyTorch nn.Linear layout).

    `fold` consecutive rows of v are folded into the lane dimension; weights become
    block-diagonal so the kernel still does plain `x @ W + b`.  Pass param_dtype=
    jnp.bfloat16 if v arrives in bf16 (halves HBM read of the weights/activations).
    """
    w1 = jnp.asarray(w1, jnp.float32)
    w2 = jnp.asarray(w2, jnp.float32)
    H2, H = w1.shape
    if fold is None:
        fold = max(1, 512 // H)                              # ~512 dense lanes for v
    w1t = _block_diag(w1.T, fold).astype(param_dtype)        # [F*H,  F*H2]
    b1r = jnp.tile(jnp.asarray(b1, jnp.float32), fold).reshape(1, -1)
    w2t = _block_diag(w2.T, fold).astype(param_dtype)        # [F*H2, F*P]
    b2r = jnp.tile(jnp.asarray(b2, jnp.float32), fold).reshape(1, -1)
    return w1t, b1r, w2t, b2r


def prepare_uncertainty_evidential_params(w1, b1, w2, b2, pred_size, fold=None,
                                          param_dtype=jnp.float32):
    """w1:[H2,H] b1:[H2] w2:[4P,H2] b2:[4P]  (LinearNormalGamma.linear).

    Regroups the interleaved output columns (4*p + c) into contiguous [mu|v|a|b]
    blocks, folds `fold` rows into lanes via block-diagonal weights, and builds the
    epilogue mask / offset rows.
    """
    P = pred_size
    w1 = jnp.asarray(w1, jnp.float32)
    w2 = jnp.asarray(w2, jnp.float32)
    H2, H = w1.shape
    if fold is None:
        fold = max(1, 512 // H)
    w1t = _block_diag(w1.T, fold).astype(param_dtype)            # [F*H,  F*H2]
    b1r = jnp.tile(jnp.asarray(b1, jnp.float32), fold).reshape(1, -1)
    perm = jnp.arange(4 * P).reshape(P, 4).T.reshape(-1)         # interleaved -> grouped
    w2g = w2.T[:, perm]                                          # [H2, 4P] grouped cols
    b2g = jnp.asarray(b2, jnp.float32)[perm]
    w2t = _block_diag(w2g, fold).astype(param_dtype)             # [F*H2, F*4P]
    b2r = jnp.tile(b2g, fold).reshape(1, -1)
    mask_base = jnp.concatenate(
        [jnp.ones((P,), jnp.float32), jnp.zeros((3 * P,), jnp.float32)])
    off_base = jnp.concatenate(
        [jnp.zeros((P,), jnp.float32),
         jnp.full((P,), MIN_VAL, jnp.float32),
         jnp.full((P,), MIN_VAL + 1.0, jnp.float32),
         jnp.full((P,), MIN_VAL, jnp.float32)])
    mu_mask = jnp.tile(mask_base, fold).reshape(1, -1)
    offsets = jnp.tile(off_base, fold).reshape(1, -1)
    return w1t, b1r, w2t, b2r, mu_mask, offsets


# ---------------------------------------------------------------------------
# Forward wrappers
# ---------------------------------------------------------------------------
def _compiler_params(vmem_limit):
    return pltpu.CompilerParams(
        dimension_semantics=("parallel",),      # shard folded-N tiles across TCs (v7x)
        vmem_limit_bytes=vmem_limit,
    )


@partial(jax.jit, static_argnames=("target_tile_bytes", "out_dtype"))
def uncertainty_head_false(v, params, *, target_tile_bytes=4 << 20,
                           out_dtype=jnp.float32):
    """uncertainty == 'False'.  v: [N, hidden].  Returns [N, P]."""
    w1t, b1r, w2t, b2r = params
    N, H = v.shape
    HF, H2F = w1t.shape
    PF = w2t.shape[1]
    fold = HF // H
    P = PF // fold
    if N % fold != 0:
        raise ValueError(f"N={N} must be a multiple of fold={fold}; "
                         "pass fold=1 to prepare_uncertainty_false_params otherwise.")
    Nf = N // fold
    vf = v.reshape(Nf, HF)                      # free row-major reinterpretation
    itemsize = jnp.dtype(v.dtype).itemsize
    min_rows = max(8, 32 // itemsize)
    tn = _pick_tile_rows(Nf, HF * itemsize, target_bytes=target_tile_bytes,
                         min_rows=min_rows)
    grid = (pl.cdiv(Nf, tn),)
    vmem = _vmem_limit_bytes([
        tn * HF * itemsize,                                   # v tile
        tn * PF * jnp.dtype(out_dtype).itemsize,              # out tile
        w1t.size * w1t.dtype.itemsize + w2t.size * w2t.dtype.itemsize,
        (b1r.size + b2r.size) * 4,
    ])
    out = pl.pallas_call(
        _uhead_false_kernel,
        out_shape=jax.ShapeDtypeStruct((Nf, PF), out_dtype),
        grid_spec=pltpu.PrefetchScalarGridSpec(
            num_scalar_prefetch=0,
            grid=grid,
            in_specs=[
                pl.BlockSpec((tn, HF), lambda i: (i, 0)),     # folded v tile (pipelined)
                pl.BlockSpec((HF, H2F), lambda i: (0, 0)),    # W1 block-diag (resident)
                pl.BlockSpec((1, H2F), lambda i: (0, 0)),     # b1 (tiled)
                pl.BlockSpec((H2F, PF), lambda i: (0, 0)),    # W2 block-diag
                pl.BlockSpec((1, PF), lambda i: (0, 0)),      # b2 (tiled)
            ],
            out_specs=pl.BlockSpec((tn, PF), lambda i: (i, 0)),
        ),
        compiler_params=_compiler_params(vmem),
    )(vf, w1t, b1r, w2t, b2r)
    return out.reshape(N, P)                    # free row-major reinterpretation


@partial(jax.jit, static_argnames=("target_tile_bytes", "out_dtype"))
def uncertainty_head_evidential_slab(v, params, *, target_tile_bytes=4 << 20,
                                     out_dtype=jnp.float32):
    """uncertainty == 'evidential'.  Returns the grouped [N, 4P] slab
    ([mu | var | alpha | beta] per row) with zero extra copies — consumers that can
    index lazily should use this entry point."""
    w1t, b1r, w2t, b2r, mu_mask, offsets = params
    N, H = v.shape
    HF, H2F = w1t.shape
    OUTF = w2t.shape[1]                         # fold * 4P (grouped per fold-block)
    fold = HF // H
    OUT = OUTF // fold                          # 4P
    if N % fold != 0:
        raise ValueError(f"N={N} must be a multiple of fold={fold}; "
                         "pass fold=1 to prepare_uncertainty_evidential_params otherwise.")
    Nf = N // fold
    vf = v.reshape(Nf, HF)
    itemsize = jnp.dtype(v.dtype).itemsize
    min_rows = max(8, 32 // itemsize)
    tn = _pick_tile_rows(Nf, HF * itemsize, target_bytes=target_tile_bytes,
                         min_rows=min_rows)
    grid = (pl.cdiv(Nf, tn),)
    vmem = _vmem_limit_bytes([
        tn * HF * itemsize,
        tn * OUTF * jnp.dtype(out_dtype).itemsize,
        w1t.size * w1t.dtype.itemsize + w2t.size * w2t.dtype.itemsize,
        (b1r.size + b2r.size + mu_mask.size + offsets.size) * 4,
    ])
    slab = pl.pallas_call(
        _uhead_evidential_kernel,
        out_shape=jax.ShapeDtypeStruct((Nf, OUTF), out_dtype),
        grid_spec=pltpu.PrefetchScalarGridSpec(
            num_scalar_prefetch=0,
            grid=grid,
            in_specs=[
                pl.BlockSpec((tn, HF), lambda i: (i, 0)),     # folded v tile (pipelined)
                pl.BlockSpec((HF, H2F), lambda i: (0, 0)),    # W1 block-diag
                pl.BlockSpec((1, H2F), lambda i: (0, 0)),     # b1
                pl.BlockSpec((H2F, OUTF), lambda i: (0, 0)),  # W2 block-diag (grouped)
                pl.BlockSpec((1, OUTF), lambda i: (0, 0)),    # b2 (grouped, tiled)
                pl.BlockSpec((1, OUTF), lambda i: (0, 0)),    # mu column mask
                pl.BlockSpec((1, OUTF), lambda i: (0, 0)),    # per-column offsets
            ],
            out_specs=pl.BlockSpec((tn, OUTF), lambda i: (i, 0)),
        ),
        compiler_params=_compiler_params(vmem),
    )(vf, w1t, b1r, w2t, b2r, mu_mask, offsets)
    return slab.reshape(N, OUT)                 # free row-major reinterpretation


@partial(jax.jit, static_argnames=("target_tile_bytes", "out_dtype"))
def uncertainty_head_evidential(v, params, *, target_tile_bytes=4 << 20,
                                out_dtype=jnp.float32):
    """uncertainty == 'evidential'.  Returns (mu, var, alpha, beta), each [N, P].
    The split is four thin column slices of the grouped slab (tiny vs. the v read);
    use uncertainty_head_evidential_slab to avoid them entirely."""
    slab = uncertainty_head_evidential_slab(
        v, params, target_tile_bytes=target_tile_bytes, out_dtype=out_dtype)
    P = slab.shape[1] // 4
    return (slab[:, 0:P], slab[:, P:2 * P], slab[:, 2 * P:3 * P], slab[:, 3 * P:4 * P])


# ---------------------------------------------------------------------------
# Pure-JAX references (match the PyTorch module)
# ---------------------------------------------------------------------------
def _reference_false(v, w1, b1, w2, b2):
    h = jax.nn.softplus(v @ w1.T + b1) - SHIFT
    return h @ w2.T + b2


def _reference_evidential(v, w1, b1, w2, b2, P):
    h = jax.nn.softplus(v @ w1.T + b1) - SHIFT
    pred = (h @ w2.T + b2).reshape(v.shape[0], P, 4)
    mu = pred[..., 0]
    var = jax.nn.softplus(pred[..., 1]) + MIN_VAL
    alpha = jax.nn.softplus(pred[..., 2]) + MIN_VAL + 1.0
    beta = jax.nn.softplus(pred[..., 3]) + MIN_VAL
    return mu, var, alpha, beta


def _xavier_uniform(key, out_ch, in_ch):
    bound = math.sqrt(6.0 / (in_ch + out_ch))
    return jax.random.uniform(key, (out_ch, in_ch), jnp.float32, -bound, bound)


if __name__ == "__main__":
    key = jax.random.PRNGKey(0)
    N, hidden, pred_size = 512, 32, 2
    H2 = hidden // 2

    kv, k1, k2, k3 = jax.random.split(key, 4)
    v = jax.random.normal(kv, (N, hidden), jnp.float32)

    # lin1: Linear(hidden, hidden//2), xavier_uniform weight, zero bias
    w1 = _xavier_uniform(k1, H2, hidden)
    b1 = jnp.zeros((H2,), jnp.float32)

    # --- mode 'False': lin2 = Linear(hidden//2, pred_size), xavier, zero bias
    w2f = _xavier_uniform(k2, pred_size, H2)
    b2f = jnp.zeros((pred_size,), jnp.float32)
    params_false = prepare_uncertainty_false_params(w1, b1, w2f, b2f)   # fold=16
    out_false = uncertainty_head_false(v, params_false)
    jax.block_until_ready(out_false)
    ref_false = _reference_false(v, w1, b1, w2f, b2f)
    assert out_false.shape == (N, pred_size)
    assert jnp.allclose(out_false, ref_false, atol=1e-5), "mismatch in 'False' mode"

    # --- mode 'evidential': lin2.linear = Linear(hidden//2, pred_size * 4)
    w2e = _xavier_uniform(k3, pred_size * 4, H2)        # deterministic synthetic init
    b2e = jnp.linspace(-0.1, 0.1, pred_size * 4).astype(jnp.float32)
    params_evid = prepare_uncertainty_evidential_params(w1, b1, w2e, b2e, pred_size)
    out_evid = uncertainty_head_evidential(v, params_evid)
    jax.block_until_ready(out_evid)
    ref_evid = _reference_evidential(v, w1, b1, w2e, b2e, pred_size)
    for got, ref in zip(out_evid, ref_evid):
        assert got.shape == (N, pred_size)
        assert jnp.allclose(got, ref, atol=1e-5), "mismatch in 'evidential' mode"

    print("KERNEL_OK")
</pallas_src>

<mosaic_0001>
module attributes {stable_mosaic.version = 11 : i64} {
  func.func @_uhead_false_kernel(%arg0: i32, %arg1: memref<16x512xf32, #tpu.memory_space<vmem>>, %arg2: memref<512x256xf32, #tpu.memory_space<vmem>>, %arg3: memref<1x256xf32, #tpu.memory_space<vmem>>, %arg4: memref<256x32xf32, #tpu.memory_space<vmem>>, %arg5: memref<1x32xf32, #tpu.memory_space<vmem>>, %arg6: memref<16x32xf32, #tpu.memory_space<vmem>>) attributes {dimension_semantics = [#tpu.dimension_semantics<parallel>], iteration_bounds = array<i64: 2>, scalar_prefetch = 0 : i64, scratch_operands = 0 : i64, tpu.core_type = #tpu.core_type<tc>, window_params = [{transform_indices = @transform_0, window_bounds = array<i64: 16, 512>}, {pipeline_mode = #tpu.pipeline_mode<synchronous>, transform_indices = @transform_1, window_bounds = array<i64: 512, 256>}, {pipeline_mode = #tpu.pipeline_mode<synchronous>, transform_indices = @transform_2, window_bounds = array<i64: 1, 256>}, {pipeline_mode = #tpu.pipeline_mode<synchronous>, transform_indices = @transform_3, window_bounds = array<i64: 256, 32>}, {pipeline_mode = #tpu.pipeline_mode<synchronous>, transform_indices = @transform_4, window_bounds = array<i64: 1, 32>}, {transform_indices = @transform_5, window_bounds = array<i64: 16, 32>}]} {
    %c0 = arith.constant 0 : index
    %c0_0 = arith.constant 0 : index
    %0 = vector.load %arg1[%c0, %c0_0] : memref<16x512xf32, #tpu.memory_space<vmem>>, vector<16x512xf32>
    %c0_1 = arith.constant 0 : index
    %c0_2 = arith.constant 0 : index
    %1 = vector.load %arg2[%c0_1, %c0_2] : memref<512x256xf32, #tpu.memory_space<vmem>>, vector<512x256xf32>
    %cst = arith.constant dense<0.000000e+00> : vector<16x256xf32>
    %2 = tpu.matmul %0, %1, %cst {dimension_numbers = #tpu.dot_dimension_numbers<[1], [0], [0], [1], [0, 0, 1, 1], [], []>} : vector<16x512xf32>, vector<512x256xf32>, vector<16x256xf32> -> vector<16x256xf32>
    %c0_3 = arith.constant 0 : index
    %c0_4 = arith.constant 0 : index
    %3 = vector.load %arg3[%c0_3, %c0_4] : memref<1x256xf32, #tpu.memory_space<vmem>>, vector<1x256xf32>
    %4 = vector.broadcast %3 : vector<1x256xf32> to vector<16x256xf32>
    %5 = arith.addf %2, %4 : vector<16x256xf32>
    %cst_5 = arith.constant 0.000000e+00 : f32
    %6 = vector.broadcast %cst_5 : f32 to vector<16x256xf32>
    %7 = arith.maximumf %5, %6 : vector<16x256xf32>
    %8 = vector.broadcast %cst_5 : f32 to vector<16x256xf32>
    %9 = arith.subf %5, %8 : vector<16x256xf32>
    %10 = arith.cmpf one, %9, %9 : vector<16x256xf32>
    %11 = vector.broadcast %cst_5 : f32 to vector<16x256xf32>
    %12 = arith.addf %5, %11 : vector<16x256xf32>
    %13 = math.absf %9 : vector<16x256xf32>
    %cst_6 = arith.constant 0.000000e+00 : f32
    %14 = vector.broadcast %cst_6 : f32 to vector<16x256xf32>
    %15 = arith.subf %14, %13 : vector<16x256xf32>
    %16 = math.exp %15 : vector<16x256xf32>
    %17 = math.log1p %16 : vector<16x256xf32>
    %18 = arith.addf %7, %17 : vector<16x256xf32>
    %19 = arith.select %10, %12, %18 : vector<16x256xi1>, vector<16x256xf32>
    %cst_7 = arith.constant 0.693147182 : f32
    %20 = vector.broadcast %cst_7 : f32 to vector<16x256xf32>
    %21 = arith.subf %19, %20 : vector<16x256xf32>
    %c0_8 = arith.constant 0 : index
    %c0_9 = arith.constant 0 : index
    %22 = vector.load %arg4[%c0_8, %c0_9] : memref<256x32xf32, #tpu.memory_space<vmem>>, vector<256x32xf32>
    %cst_10 = arith.constant dense<0.000000e+00> : vector<16x32xf32>
    %23 = tpu.matmul %21, %22, %cst_10 {dimension_numbers = #tpu.dot_dimension_numbers<[1], [0], [0], [1], [0, 0, 1, 1], [], []>} : vector<16x256xf32>, vector<256x32xf32>, vector<16x32xf32> -> vector<16x32xf32>
    %c0_11 = arith.constant 0 : index
    %c0_12 = arith.constant 0 : index
    %24 = vector.load %arg5[%c0_11, %c0_12] : memref<1x32xf32, #tpu.memory_space<vmem>>, vector<1x32xf32>
    %25 = vector.broadcast %24 : vector<1x32xf32> to vector<16x32xf32>
    %26 = arith.addf %23, %25 : vector<16x32xf32>
    %c0_13 = arith.constant 0 : index
    %c0_14 = arith.constant 0 : index
    %27 = vector.load %arg6[%c0_13, %c0_14] : memref<16x32xf32, #tpu.memory_space<vmem>>, vector<16x32xf32>
    tpu.vector_store %arg6[%c0_13, %c0_14], %26 {strides = array<i32>} : memref<16x32xf32, #tpu.memory_space<vmem>>, vector<16x32xf32>,
    return
  }
  func.func @transform_0(%arg0: i32) -> (i32, i32) {
    %c0_i32 = arith.constant 0 : i32
    %c0_i32_0 = arith.constant 0 : i32
    return %arg0, %c0_i32 : i32, i32
  }
  func.func @transform_1(%arg0: i32) -> (i32, i32) {
    %c0_i32 = arith.constant 0 : i32
    %c0_i32_0 = arith.constant 0 : i32
    %c0_i32_1 = arith.constant 0 : i32
    return %c0_i32, %c0_i32_0 : i32, i32
  }
  func.func @transform_2(%arg0: i32) -> (i32, i32) {
    %c0_i32 = arith.constant 0 : i32
    %c0_i32_0 = arith.constant 0 : i32
    %c0_i32_1 = arith.constant 0 : i32
    return %c0_i32, %c0_i32_0 : i32, i32
  }
  func.func @transform_3(%arg0: i32) -> (i32, i32) {
    %c0_i32 = arith.constant 0 : i32
    %c0_i32_0 = arith.constant 0 : i32
    %c0_i32_1 = arith.constant 0 : i32
    return %c0_i32, %c0_i32_0 : i32, i32
  }
  func.func @transform_4(%arg0: i32) -> (i32, i32) {
    %c0_i32 = arith.constant 0 : i32
    %c0_i32_0 = arith.constant 0 : i32
    %c0_i32_1 = arith.constant 0 : i32
    return %c0_i32, %c0_i32_0 : i32, i32
  }
  func.func @transform_5(%arg0: i32) -> (i32, i32) {
    %c0_i32 = arith.constant 0 : i32
    %c0_i32_0 = arith.constant 0 : i32
    return %arg0, %c0_i32 : i32, i32
  }
}

</mosaic_0001>

<bundles_post_ra>
// kernel: uncertainty_head_false.1
= control target key start
LH: loop header
LB: loop body
LE: loop exit
PB: predicated region body
PF: predicated region fallthrough
CT: control target
= control target key end

     0   :  { %s1084_s18 = smov 0   ;;  %s1632_s0 = inlined_call_operand.vmem [shape: f32[32,512], index: 0, kind: input, shape index: {}]   ;;  %s1633_s1 = inlined_call_operand.vmem [shape: f32[512,256], index: 1, kind: input, shape index: {}]   ;;  %s1634_s2 = inlined_call_operand.vmem [shape: f32[1,256], index: 2, kind: input, shape index: {}]   ;;  %s1635_s3 = inlined_call_operand.vmem [shape: f32[256,32], index: 3, kind: input, shape index: {}]   ;;  %s1636_s4 = inlined_call_operand.vmem [shape: f32[1,32], index: 4, kind: input, shape index: {}]   ;;  %s1637_s5 = inlined_call_operand.vmem [shape: f32[32,32], index: 5, kind: output, shape index: {}]  }
   0x1 LB: > { %s782_s19 = sadd.s32 4294967295, %s1052_s18   ;;  %p786_p0 = scmp.ge.s32.totalorder %s1052_s18, 1  ;;  %s1052_s18 = sphi %s1084_s18, %s15_s18  }
   0x2   : > { %p189_p1 = scmp.lt.s32.totalorder %s1052_s18, 3 }
   0x4   : > { %p190_p2 = pnand %p786_p0, %p189_p1 }
   0x5   : > { %v240_v0 = vld [vmem:[%s1633_s1 + $0x8] sm:$0xff] (!%p190_p2)  ;;  %v242_v1 = vld [vmem:[%s1633_s1 + $0x18] sm:$0xff] (!%p190_p2)  ;;  %v239_v2 = vld [vmem:[%s1633_s1] sm:$0xff] (!%p190_p2)  ;;  %s787_s6 = sshll.u32 (!%p190_p2), %s782_s19, 1  ;;  %vm723_vm8 = vcmask (!%p190_p2), 261120  }
   0x6   : > { %193 = sbr.rel (%p190_p2) target bundleno = 550 (0x226), region = 40  ;;  %v838_v3 = vpack.c.bf16 (!%p190_p2), %v242_v1, %v240_v0  ;;  %v241_v4 = vld [vmem:[%s1633_s1 + $0x10] sm:$0xff] (!%p190_p2)  ;;  %v304_v5 = vld [vmem:[%s1633_s1 + $0x208] sm:$0xff] (!%p190_p2)  ;;  %v306_v6 = vld [vmem:[%s1633_s1 + $0x218] sm:$0xff] (!%p190_p2)  ;;  %p219_p3 = scmp.lt.s32.totalorder (!%p190_p2), %s787_s6, 3 }
   0x7   : > { %v840_v7 = vpack.c.bf16 (!%p190_p2), %v241_v4, %v239_v2  ;;  %v902_v8 = vpack.c.bf16 (!%p190_p2), %v306_v6, %v304_v5  ;;  %v303_v9 = vld [vmem:[%s1633_s1 + $0x200] sm:$0xff] (!%p190_p2)  ;;  %v305_v10 = vld [vmem:[%s1633_s1 + $0x210] sm:$0xff] (!%p190_p2)  ;;  %v244_v11 = vld [vmem:[%s1633_s1 + $0x28] sm:$0xff] (!%p190_p2) }
   0x8   : > { %839 = vmatprep.subr.bf16.mxu1 (!%p190_p2), %v838_v3  ;;  %v904_v12 = vpack.c.bf16 (!%p190_p2), %v305_v10, %v303_v9  ;;  %v246_v13 = vld [vmem:[%s1633_s1 + $0x38] sm:$0xff] (!%p190_p2)  ;;  %v243_v14 = vld [vmem:[%s1633_s1 + $0x20] sm:$0xff] (!%p190_p2)  ;;  %v245_v15 = vld [vmem:[%s1633_s1 + $0x30] sm:$0xff] (!%p190_p2) }
   0x9   : > { %841 = vmatpush1.bf16.msra.mxu1 (!%p190_p2), %v840_v7  ;;  %903 = vmatprep.subr.bf16.mxu0 (!%p190_p2), %v902_v8  ;;  %v842_v16 = vpack.c.bf16 (!%p190_p2), %v246_v13, %v244_v11  ;;  %v844_v17 = vpack.c.bf16 (!%p190_p2), %v245_v15, %v243_v14  ;;  %v308_v18 = vld [vmem:[%s1633_s1 + $0x228] sm:$0xff] (!%p190_p2)  ;;  %v310_v19 = vld [vmem:[%s1633_s1 + $0x238] sm:$0xff] (!%p190_p2)  ;;  %v307_v20 = vld [vmem:[%s1633_s1 + $0x220] sm:$0xff] (!%p190_p2) }
   0xa   : > { %905 = vmatpush1.bf16.msra.mxu0 (!%p190_p2), %v904_v12  ;;  %v906_v21 = vpack.c.bf16 (!%p190_p2), %v310_v19, %v308_v18  ;;  %v309_v22 = vld [vmem:[%s1633_s1 + $0x230] sm:$0xff] (!%p190_p2)  ;;  %v248_v23 = vld [vmem:[%s1633_s1 + $0x48] sm:$0xff] (!%p190_p2)  ;;  %v250_v24 = vld [vmem:[%s1633_s1 + $0x58] sm:$0xff] (!%p190_p2) }
   0xb   : > { %843 = vmatprep.subr.bf16.mxu1 (!%p190_p2), %v842_v16  ;;  %v908_v25 = vpack.c.bf16 (!%p190_p2), %v309_v22, %v307_v20  ;;  %v846_v26 = vpack.c.bf16 (!%p190_p2), %v250_v24, %v248_v23  ;;  %v247_v27 = vld [vmem:[%s1633_s1 + $0x40] sm:$0xff] (!%p190_p2)  ;;  %v249_v28 = vld [vmem:[%s1633_s1 + $0x50] sm:$0xff] (!%p190_p2)  ;;  %v312_v29 = vld [vmem:[%s1633_s1 + $0x248] sm:$0xff] (!%p190_p2) }
   0xc   : > { %907 = vmatprep.subr.bf16.mxu0 (!%p190_p2), %v906_v21  ;;  %v314_v30 = vld [vmem:[%s1633_s1 + $0x258] sm:$0xff] (!%p190_p2)  ;;  %v311_v31 = vld [vmem:[%s1633_s1 + $0x240] sm:$0xff] (!%p190_p2)  ;;  %v313_v32 = vld [vmem:[%s1633_s1 + $0x250] sm:$0xff] (!%p190_p2)  ;;  %v848_v33 = vpack.c.bf16 (!%p190_p2), %v249_v28, %v247_v27 }
   0xd   : > { %845 = vmatpush1.bf16.msra.mxu1 %v844_v17  ;;  %v910_v34 = vpack.c.bf16 %v314_v30, %v312_v29  ;;  %v252_v35 = vld [vmem:[%s1633_s1 + $0x68] sm:$0xff]  ;;  %v254_v36 = vld [vmem:[%s1633_s1 + $0x78] sm:$0xff]  ;;  %v251_v37 = vld [vmem:[%s1633_s1 + $0x60] sm:$0xff]  ;;  %v912_v38 = vpack.c.bf16 %v313_v32, %v311_v31  ;;  %s1639_s6 = smov (!%p219_p3, %s787_s6), 3 }
   0xe   : > { %909 = vmatpush1.bf16.msra.mxu0 %v908_v25  ;;  %847 = vmatprep.subr.bf16.mxu1 %v846_v26  ;;  %v850_v39 = vpack.c.bf16 %v254_v36, %v252_v35  ;;  %v253_v40 = vld [vmem:[%s1633_s1 + $0x70] sm:$0xff]  ;;  %v316_v41 = vld [vmem:[%s1633_s1 + $0x268] sm:$0xff]  ;;  %v318_v42 = vld [vmem:[%s1633_s1 + $0x278] sm:$0xff]  ;;  %s799_s27 = sshll.u32 %s1639_s6, 5  ;;  %s791_s28 = sshll.u32 %s1639_s6, 3 }
   0xf   : > { %911 = vmatprep.subr.bf16.mxu0 %v910_v34  ;;  %v914_v43 = vpack.c.bf16 %v318_v42, %v316_v41  ;;  %v315_v44 = vld [vmem:[%s1633_s1 + $0x260] sm:$0xff]  ;;  %v317_v45 = vld [vmem:[%s1633_s1 + $0x270] sm:$0xff]  ;;  %v256_v46 = vld [vmem:[%s1633_s1 + $0x88] sm:$0xff]  ;;  %v852_v48 = vpack.c.bf16 %v253_v40, %v251_v37  ;;  %s1377_s23 = scalar_lea.vmem %s1632_s0, %s799_s27  ;;  %s229_s8 = scalar_lea.vmem %s1637_s5, %s791_s28 }
  0x10   : > { %v258_v47 = vld [vmem:[%s1633_s1 + $0x98] sm:$0xff]  ;;  %v320_v49 = vld [vmem:[%s1633_s1 + $0x288] sm:$0xff]  ;;  %v916_v51 = vpack.c.bf16 %v317_v45, %v315_v44  ;;  %v255_v53 = vld [vmem:[%s1633_s1 + $0x80] sm:$0xff] }
  0x11   : > { %849 = vmatpush1.bf16.msra.mxu1 %v848_v33  ;;  %v322_v50 = vld [vmem:[%s1633_s1 + $0x298] sm:$0xff]  ;;  %v854_v52 = vpack.c.bf16 %v258_v47, %v256_v46  ;;  %v257_v54 = vld [vmem:[%s1633_s1 + $0x90] sm:$0xff]  ;;  %v319_v55 = vld [vmem:[%s1633_s1 + $0x280] sm:$0xff] }
  0x12   : > { %913 = vmatpush1.bf16.msra.mxu0 %v912_v38  ;;  %851 = vmatprep.subr.bf16.mxu1 %v850_v39  ;;  %v918_v56 = vpack.c.bf16 %v322_v50, %v320_v49  ;;  %v321_v57 = vld [vmem:[%s1633_s1 + $0x290] sm:$0xff]  ;;  %v260_v58 = vld [vmem:[%s1633_s1 + $0xa8] sm:$0xff]  ;;  %v262_v59 = vld [vmem:[%s1633_s1 + $0xb8] sm:$0xff]  ;;  %v856_v62 = vpack.c.bf16 %v257_v54, %v255_v53 }
  0x13   : > { %915 = vmatprep.subr.bf16.mxu0 %v914_v43  ;;  %v324_v60 = vld [vmem:[%s1633_s1 + $0x2a8] sm:$0xff]  ;;  %v326_v61 = vld [vmem:[%s1633_s1 + $0x2b8] sm:$0xff]  ;;  %v920_v63 = vpack.c.bf16 %v321_v57, %v319_v55  ;;  %v858_v0 = vpack.c.bf16 %v262_v59, %v260_v58  ;;  %v259_v1 = vld [vmem:[%s1633_s1 + $0xa0] sm:$0xff] }
  0x14   : > { %v261_v2 = vld [vmem:[%s1633_s1 + $0xb0] sm:$0xff]  ;;  %v323_v3 = vld [vmem:[%s1633_s1 + $0x2a0] sm:$0xff]  ;;  %v922_v4 = vpack.c.bf16 %v326_v61, %v324_v60  ;;  %v264_v6 = vld [vmem:[%s1633_s1 + $0xc8] sm:$0xff] }
  0x15   : > { %853 = vmatpush1.bf16.msra.mxu1 %v852_v48  ;;  %v325_v5 = vld [vmem:[%s1633_s1 + $0x2b0] sm:$0xff]  ;;  %v266_v7 = vld [vmem:[%s1633_s1 + $0xd8] sm:$0xff]  ;;  %v328_v8 = vld [vmem:[%s1633_s1 + $0x2c8] sm:$0xff]  ;;  %v860_v10 = vpack.c.bf16 %v261_v2, %v259_v1 }
  0x16   : > { %917 = vmatpush1.bf16.msra.mxu0 %v916_v51  ;;  %855 = vmatprep.subr.bf16.mxu1 %v854_v52  ;;  %v330_v9 = vld [vmem:[%s1633_s1 + $0x2d8] sm:$0xff]  ;;  %v924_v11 = vpack.c.bf16 %v325_v5, %v323_v3  ;;  %v862_v12 = vpack.c.bf16 %v266_v7, %v264_v6  ;;  %v263_v13 = vld [vmem:[%s1633_s1 + $0xc0] sm:$0xff]  ;;  %v265_v14 = vld [vmem:[%s1633_s1 + $0xd0] sm:$0xff] }
  0x17   : > { %919 = vmatprep.subr.bf16.mxu0 %v918_v56  ;;  %v327_v15 = vld [vmem:[%s1633_s1 + $0x2c0] sm:$0xff]  ;;  %v926_v16 = vpack.c.bf16 %v330_v9, %v328_v8  ;;  %v329_v17 = vld [vmem:[%s1633_s1 + $0x2d0] sm:$0xff]  ;;  %v268_v18 = vld [vmem:[%s1633_s1 + $0xe8] sm:$0xff]  ;;  %v864_v22 = vpack.c.bf16 %v265_v14, %v263_v13 }
  0x18   : > { %v270_v19 = vld [vmem:[%s1633_s1 + $0xf8] sm:$0xff]  ;;  %v332_v20 = vld [vmem:[%s1633_s1 + $0x2e8] sm:$0xff]  ;;  %v928_v23 = vpack.c.bf16 %v329_v17, %v327_v15  ;;  %v267_v25 = vld [vmem:[%s1633_s1 + $0xe0] sm:$0xff] }
  0x19   : > { %857 = vmatpush1.bf16.msra.mxu1 %v856_v62  ;;  %v334_v21 = vld [vmem:[%s1633_s1 + $0x2f8] sm:$0xff]  ;;  %v866_v24 = vpack.c.bf16 %v270_v19, %v268_v18  ;;  %v269_v26 = vld [vmem:[%s1633_s1 + $0xf0] sm:$0xff]  ;;  %v331_v27 = vld [vmem:[%s1633_s1 + $0x2e0] sm:$0xff] }
  0x1a   : > { %921 = vmatpush1.bf16.msra.mxu0 %v920_v63  ;;  %859 = vmatprep.subr.bf16.mxu1 %v858_v0  ;;  %v930_v28 = vpack.c.bf16 %v334_v21, %v332_v20  ;;  %v333_v29 = vld [vmem:[%s1633_s1 + $0x2f0] sm:$0xff]  ;;  %v272_v30 = vld [vmem:[%s1633_s1 + $0x108] sm:$0xff]  ;;  %v274_v31 = vld [vmem:[%s1633_s1 + $0x118] sm:$0xff]  ;;  %v868_v34 = vpack.c.bf16 %v269_v26, %v267_v25 }
  0x1b   : > { %923 = vmatprep.subr.bf16.mxu0 %v922_v4  ;;  %v336_v32 = vld [vmem:[%s1633_s1 + $0x308] sm:$0xff]  ;;  %v338_v33 = vld [vmem:[%s1633_s1 + $0x318] sm:$0xff]  ;;  %v932_v35 = vpack.c.bf16 %v333_v29, %v331_v27  ;;  %v870_v36 = vpack.c.bf16 %v274_v31, %v272_v30  ;;  %v271_v37 = vld [vmem:[%s1633_s1 + $0x100] sm:$0xff] }
  0x1c   : > { %v273_v38 = vld [vmem:[%s1633_s1 + $0x110] sm:$0xff]  ;;  %v335_v39 = vld [vmem:[%s1633_s1 + $0x300] sm:$0xff]  ;;  %v934_v40 = vpack.c.bf16 %v338_v33, %v336_v32  ;;  %v276_v42 = vld [vmem:[%s1633_s1 + $0x128] sm:$0xff] }
  0x1d   : > { %861 = vmatpush1.bf16.msra.mxu1 %v860_v10  ;;  %v337_v41 = vld [vmem:[%s1633_s1 + $0x310] sm:$0xff]  ;;  %v278_v43 = vld [vmem:[%s1633_s1 + $0x138] sm:$0xff]  ;;  %v340_v44 = vld [vmem:[%s1633_s1 + $0x328] sm:$0xff]  ;;  %v872_v46 = vpack.c.bf16 %v273_v38, %v271_v37 }
  0x1e   : > { %925 = vmatpush1.bf16.msra.mxu0 %v924_v11  ;;  %863 = vmatprep.subr.bf16.mxu1 %v862_v12  ;;  %v342_v45 = vld [vmem:[%s1633_s1 + $0x338] sm:$0xff]  ;;  %v936_v47 = vpack.c.bf16 %v337_v41, %v335_v39  ;;  %v874_v48 = vpack.c.bf16 %v278_v43, %v276_v42  ;;  %v275_v49 = vld [vmem:[%s1633_s1 + $0x120] sm:$0xff]  ;;  %v277_v50 = vld [vmem:[%s1633_s1 + $0x130] sm:$0xff] }
  0x1f   : > { %927 = vmatprep.subr.bf16.mxu0 %v926_v16  ;;  %v339_v51 = vld [vmem:[%s1633_s1 + $0x320] sm:$0xff]  ;;  %v938_v52 = vpack.c.bf16 %v342_v45, %v340_v44  ;;  %v341_v53 = vld [vmem:[%s1633_s1 + $0x330] sm:$0xff]  ;;  %v280_v54 = vld [vmem:[%s1633_s1 + $0x148] sm:$0xff]  ;;  %v876_v58 = vpack.c.bf16 %v277_v50, %v275_v49 }
  0x20   : > { %v282_v55 = vld [vmem:[%s1633_s1 + $0x158] sm:$0xff]  ;;  %v344_v56 = vld [vmem:[%s1633_s1 + $0x348] sm:$0xff]  ;;  %v940_v59 = vpack.c.bf16 %v341_v53, %v339_v51  ;;  %v279_v61 = vld [vmem:[%s1633_s1 + $0x140] sm:$0xff] }
  0x21   : > { %865 = vmatpush1.bf16.msra.mxu1 %v864_v22  ;;  %v346_v57 = vld [vmem:[%s1633_s1 + $0x358] sm:$0xff]  ;;  %v878_v60 = vpack.c.bf16 %v282_v55, %v280_v54  ;;  %v281_v62 = vld [vmem:[%s1633_s1 + $0x150] sm:$0xff]  ;;  %v343_v63 = vld [vmem:[%s1633_s1 + $0x340] sm:$0xff] }
  0x22   : > { %929 = vmatpush1.bf16.msra.mxu0 %v928_v23  ;;  %867 = vmatprep.subr.bf16.mxu1 %v866_v24  ;;  %v942_v0 = vpack.c.bf16 %v346_v57, %v344_v56  ;;  %v345_v1 = vld [vmem:[%s1633_s1 + $0x350] sm:$0xff]  ;;  %v284_v2 = vld [vmem:[%s1633_s1 + $0x168] sm:$0xff]  ;;  %v286_v3 = vld [vmem:[%s1633_s1 + $0x178] sm:$0xff]  ;;  %v880_v6 = vpack.c.bf16 %v281_v62, %v279_v61 }
  0x23   : > { %931 = vmatprep.subr.bf16.mxu0 %v930_v28  ;;  %v348_v4 = vld [vmem:[%s1633_s1 + $0x368] sm:$0xff]  ;;  %v350_v5 = vld [vmem:[%s1633_s1 + $0x378] sm:$0xff]  ;;  %v283_v7 = vld [vmem:[%s1633_s1 + $0x160] sm:$0xff]  ;;  %v944_v8 = vpack.c.bf16 %v345_v1, %v343_v63  ;;  %v882_v9 = vpack.c.bf16 %v286_v3, %v284_v2 }
  0x24   : > { %v285_v10 = vld [vmem:[%s1633_s1 + $0x170] sm:$0xff]  ;;  %v347_v11 = vld [vmem:[%s1633_s1 + $0x360] sm:$0xff]  ;;  %v946_v13 = vpack.c.bf16 %v350_v5, %v348_v4  ;;  %v288_v14 = vld [vmem:[%s1633_s1 + $0x188] sm:$0xff] }
  0x25   : > { %869 = vmatpush1.bf16.msra.mxu1 %v868_v34  ;;  %v349_v12 = vld [vmem:[%s1633_s1 + $0x370] sm:$0xff]  ;;  %v290_v15 = vld [vmem:[%s1633_s1 + $0x198] sm:$0xff]  ;;  %v232_v16 = vld [vmem:[%s1377_s23 + $0x8] sm:$0xff]  ;;  %v884_v20 = vpack.c.bf16 %v285_v10, %v283_v7 }
  0x26   : > { %933 = vmatpush1.bf16.msra.mxu0 %v932_v35  ;;  %871 = vmatprep.subr.bf16.mxu1 %v870_v36  ;;  %v352_v17 = vld [vmem:[%s1633_s1 + $0x388] sm:$0xff]  ;;  %v354_v18 = vld [vmem:[%s1633_s1 + $0x398] sm:$0xff]  ;;  %v948_v21 = vpack.c.bf16 %v349_v12, %v347_v11  ;;  %v886_v22 = vpack.c.bf16 %v290_v15, %v288_v14  ;;  %v287_v23 = vld [vmem:[%s1633_s1 + $0x180] sm:$0xff] }
  0x27   : > { %935 = vmatprep.subr.bf16.mxu0 %v934_v40  ;;  %443 = vmatprep.mubr.f32.mxu1 %v232_v16  ;;  %v234_v19 = vld [vmem:[%s1377_s23 + $0x18] sm:$0xff]  ;;  %v289_v24 = vld [vmem:[%s1633_s1 + $0x190] sm:$0xff]  ;;  %v351_v25 = vld [vmem:[%s1633_s1 + $0x380] sm:$0xff]  ;;  %v950_v26 = vpack.c.bf16 %v354_v18, %v352_v17 }
  0x28   : > { %520 = vmatprep.mubr.f32.mxu0 %v234_v19  ;;  %v353_v27 = vld [vmem:[%s1633_s1 + $0x390] sm:$0xff]  ;;  %v292_v28 = vld [vmem:[%s1633_s1 + $0x1a8] sm:$0xff]  ;;  %v294_v29 = vld [vmem:[%s1633_s1 + $0x1b8] sm:$0xff]  ;;  %v888_v32 = vpack.c.bf16 %v289_v24, %v287_v23 }
  0x29   : > { %873 = vmatpush1.bf16.msra.mxu1 %v872_v46  ;;  %v356_v30 = vld [vmem:[%s1633_s1 + $0x3a8] sm:$0xff]  ;;  %v358_v31 = vld [vmem:[%s1633_s1 + $0x3b8] sm:$0xff]  ;;  %v952_v33 = vpack.c.bf16 %v353_v27, %v351_v25  ;;  %v890_v34 = vpack.c.bf16 %v294_v29, %v292_v28  ;;  %v291_v35 = vld [vmem:[%s1633_s1 + $0x1a0] sm:$0xff] }
  0x2a   : > { %937 = vmatpush1.bf16.msra.mxu0 %v936_v47  ;;  %875 = vmatprep.subr.bf16.mxu1 %v874_v48  ;;  %v293_v36 = vld [vmem:[%s1633_s1 + $0x1b0] sm:$0xff]  ;;  %v355_v37 = vld [vmem:[%s1633_s1 + $0x3a0] sm:$0xff]  ;;  %v954_v38 = vpack.c.bf16 %v358_v31, %v356_v30  ;;  %v296_v40 = vld [vmem:[%s1633_s1 + $0x1c8] sm:$0xff] }
  0x2b   : > { %939 = vmatprep.subr.bf16.mxu0 %v938_v52  ;;  %v357_v39 = vld [vmem:[%s1633_s1 + $0x3b0] sm:$0xff]  ;;  %v298_v41 = vld [vmem:[%s1633_s1 + $0x1d8] sm:$0xff]  ;;  %v360_v42 = vld [vmem:[%s1633_s1 + $0x3c8] sm:$0xff]  ;;  %v892_v44 = vpack.c.bf16 %v293_v36, %v291_v35 }
  0x2c   : > { %v362_v43 = vld [vmem:[%s1633_s1 + $0x3d8] sm:$0xff]  ;;  %v956_v45 = vpack.c.bf16 %v357_v39, %v355_v37  ;;  %v894_v46 = vpack.c.bf16 %v298_v41, %v296_v40  ;;  %v295_v47 = vld [vmem:[%s1633_s1 + $0x1c0] sm:$0xff]  ;;  %v297_v48 = vld [vmem:[%s1633_s1 + $0x1d0] sm:$0xff] }
  0x2d   : > { %877 = vmatpush1.bf16.msra.mxu1 %v876_v58  ;;  %v359_v49 = vld [vmem:[%s1633_s1 + $0x3c0] sm:$0xff]  ;;  %v958_v50 = vpack.c.bf16 %v362_v43, %v360_v42  ;;  %v361_v51 = vld [vmem:[%s1633_s1 + $0x3d0] sm:$0xff]  ;;  %v300_v52 = vld [vmem:[%s1633_s1 + $0x1e8] sm:$0xff]  ;;  %v896_v56 = vpack.c.bf16 %v297_v48, %v295_v47 }
  0x2e   : > { %941 = vmatpush1.bf16.msra.mxu0 %v940_v59  ;;  %879 = vmatprep.subr.bf16.mxu1 %v878_v60  ;;  %v302_v53 = vld [vmem:[%s1633_s1 + $0x1f8] sm:$0xff]  ;;  %v364_v54 = vld [vmem:[%s1633_s1 + $0x3e8] sm:$0xff]  ;;  %v960_v57 = vpack.c.bf16 %v361_v51, %v359_v49  ;;  %v299_v59 = vld [vmem:[%s1633_s1 + $0x1e0] sm:$0xff] }
  0x2f   : > { %943 = vmatprep.subr.bf16.mxu0 %v942_v0  ;;  %v366_v55 = vld [vmem:[%s1633_s1 + $0x3f8] sm:$0xff]  ;;  %v898_v58 = vpack.c.bf16 %v302_v53, %v300_v52  ;;  %v301_v60 = vld [vmem:[%s1633_s1 + $0x1f0] sm:$0xff]  ;;  %v363_v62 = vld [vmem:[%s1633_s1 + $0x3e0] sm:$0xff] }
  0x30   : > { %v962_v61 = vpack.c.bf16 %v366_v55, %v364_v54  ;;  %v365_v63 = vld [vmem:[%s1633_s1 + $0x3f0] sm:$0xff]  ;;  %v900_v0 = vpack.c.bf16 %v301_v60, %v299_v59  ;;  %v231_v2 = vld [vmem:[%s1377_s23] sm:$0xff]  ;;  %v236_v4 = vld [vmem:[%s1377_s23 + $0x28] sm:$0xff] }
  0x31   : > { %881 = vmatpush1.bf16.msra.mxu1 %v880_v6  ;;  %v964_v1 = vpack.c.bf16 %v365_v63, %v363_v62  ;;  %v233_v3 = vld [vmem:[%s1377_s23 + $0x10] sm:$0xff]  ;;  %v238_v5 = vld [vmem:[%s1377_s23 + $0x38] sm:$0xff]  ;;  %v235_v6 = vld [vmem:[%s1377_s23 + $0x20] sm:$0xff] }
  0x32   : > { %945 = vmatpush1.bf16.msra.mxu0 %v944_v8  ;;  %883 = vmatprep.subr.bf16.mxu1 %v882_v9  ;;  %v237_v7 = vld [vmem:[%s1377_s23 + $0x30] sm:$0xff]  ;;  %v625_v8 = vld [vmem:[%s1635_s3 + $0x80] sm:$0xff]  ;;  %v626_v9 = vld [vmem:[%s1635_s3 + $0x88] sm:$0xff] }
  0x33   : > { %947 = vmatprep.subr.bf16.mxu0 %v946_v13  ;;  %v966_v10 = vpack.c.bf16 %v626_v9, %v625_v8  ;;  %v609_v11 = vld [vmem:[%s1635_s3] sm:$0xff]  ;;  %v610_v12 = vld [vmem:[%s1635_s3 + $0x8] sm:$0xff]  ;;  %v627_v14 = vld [vmem:[%s1635_s3 + $0x90] sm:$0xff] }
  0x34   : > { %v968_v13 = vpack.c.bf16 %v610_v12, %v609_v11  ;;  %v628_v15 = vld [vmem:[%s1635_s3 + $0x98] sm:$0xff]  ;;  %v611_v17 = vld [vmem:[%s1635_s3 + $0x10] sm:$0xff]  ;;  %v613_v23 = vld [vmem:[%s1635_s3 + $0x20] sm:$0xff] }
  0x35   : > { %885 = vmatpush1.bf16.msra.mxu1 %v884_v20  ;;  %v970_v16 = vpack.c.bf16 %v628_v15, %v627_v14  ;;  %v612_v18 = vld [vmem:[%s1635_s3 + $0x18] sm:$0xff]  ;;  %v629_v20 = vld [vmem:[%s1635_s3 + $0xa0] sm:$0xff]  ;;  %v614_v24 = vld [vmem:[%s1635_s3 + $0x28] sm:$0xff] }
  0x36   : > { %949 = vmatpush1.bf16.msra.mxu0 %v948_v21  ;;  %887 = vmatprep.subr.bf16.mxu1 %v886_v22  ;;  %v972_v19 = vpack.c.bf16 %v612_v18, %v611_v17  ;;  %v630_v21 = vld [vmem:[%s1635_s3 + $0xa8] sm:$0xff]  ;;  %v976_v25 = vpack.c.bf16 %v614_v24, %v613_v23  ;;  %v632_v27 = vld [vmem:[%s1635_s3 + $0xb8] sm:$0xff]  ;;  %v615_v29 = vld [vmem:[%s1635_s3 + $0x30] sm:$0xff] }
  0x37   : > { %951 = vmatprep.subr.bf16.mxu0 %v950_v26  ;;  %v974_v22 = vpack.c.bf16 %v630_v21, %v629_v20  ;;  %v631_v26 = vld [vmem:[%s1635_s3 + $0xb0] sm:$0xff]  ;;  %v616_v30 = vld [vmem:[%s1635_s3 + $0x38] sm:$0xff]  ;;  %v617_v35 = vld [vmem:[%s1635_s3 + $0x40] sm:$0xff] }
  0x38   : > { %v978_v28 = vpack.c.bf16 %v632_v27, %v631_v26  ;;  %v980_v31 = vpack.c.bf16 %v616_v30, %v615_v29  ;;  %v618_v36 = vld [vmem:[%s1635_s3 + $0x48] sm:$0xff]  ;;  %v636_v39 = vld [vmem:[%s1635_s3 + $0xd8] sm:$0xff]  ;;  %v619_v41 = vld [vmem:[%s1635_s3 + $0x50] sm:$0xff] }
  0x39   : > { %889 = vmatpush1.bf16.msra.mxu1 %v888_v32  ;;  %v633_v32 = vld [vmem:[%s1635_s3 + $0xc0] sm:$0xff]  ;;  %v984_v37 = vpack.c.bf16 %v618_v36, %v617_v35  ;;  %v620_v42 = vld [vmem:[%s1635_s3 + $0x58] sm:$0xff]  ;;  %v622_v48 = vld [vmem:[%s1635_s3 + $0x68] sm:$0xff] }
  0x3a   : > { %953 = vmatpush1.bf16.msra.mxu0 %v952_v33  ;;  %891 = vmatprep.subr.bf16.mxu1 %v890_v34  ;;  %v634_v33 = vld [vmem:[%s1635_s3 + $0xc8] sm:$0xff]  ;;  %v988_v43 = vpack.c.bf16 %v620_v42, %v619_v41  ;;  %v621_v47 = vld [vmem:[%s1635_s3 + $0x60] sm:$0xff]  ;;  %v640_v51 = vld [vmem:[%s1635_s3 + $0xf8] sm:$0xff] }
  0x3b   : > { %955 = vmatprep.subr.bf16.mxu0 %v954_v38  ;;  %v982_v34 = vpack.c.bf16 %v634_v33, %v633_v32  ;;  %v635_v38 = vld [vmem:[%s1635_s3 + $0xd0] sm:$0xff]  ;;  %v992_v49 = vpack.c.bf16 %v622_v48, %v621_v47  ;;  %v624_v54 = vld [vmem:[%s1635_s3 + $0x78] sm:$0xff]  ;;  %v367_v59 = vld [vmem:[%s1634_s2] sm:$0x3] }
  0x3c   : > { %v986_v40 = vpack.c.bf16 %v636_v39, %v635_v38  ;;  %v623_v53 = vld [vmem:[%s1635_s3 + $0x70] sm:$0xff] }
  0x3d   : > { %893 = vmatpush1.bf16.msra.mxu1 %v892_v44  ;;  %v637_v44 = vld [vmem:[%s1635_s3 + $0xe0] sm:$0xff]  ;;  %v996_v55 = vpack.c.bf16 %v624_v54, %v623_v53 }
  0x3e   : > { %957 = vmatpush1.bf16.msra.mxu0 %v956_v45  ;;  %895 = vmatprep.subr.bf16.mxu1 %v894_v46  ;;  %v638_v45 = vld [vmem:[%s1635_s3 + $0xe8] sm:$0xff] }
  0x3f   : > { %959 = vmatprep.subr.bf16.mxu0 %v958_v50  ;;  %v990_v46 = vpack.c.bf16 %v638_v45, %v637_v44  ;;  %v639_v50 = vld [vmem:[%s1635_s3 + $0xf0] sm:$0xff] }
  0x40   : > { %v994_v52 = vpack.c.bf16 %v640_v51, %v639_v50 }
  0x41   : > { %897 = vmatpush1.bf16.msra.mxu1 %v896_v56  ;;  %v369_v56 = vlaneseq }
  0x42   : > { %961 = vmatpush1.bf16.msra.mxu0 %v960_v57  ;;  %899 = vmatprep.subr.bf16.mxu1 %v898_v58 }
  0x43   : > { %963 = vmatprep.subr.bf16.mxu0 %v962_v61  ;;  %v370_v57 = vshrl.u32 %v369_v56, 7 }
  0x45   : > { %901 = vmatpush1.bf16.msra.mxu1 %v900_v0  ;;  %v371_v58 = vsub.s32 0, %v370_v57  ;;  %v375_v60 = vsub.s32 1, %v370_v57 }
  0x46   : > { %965 = vmatpush1.bf16.msra.mxu0 %v964_v1  ;;  %998 = vmatprep.subr.bf16.mxu1 %v966_v10 }
  0x47   : > { %967 = vmatprep.subr.bf16.mxu0 %v966_v10  ;;  %v372_v61 = vrot.slane %v367_v59, %v371_v58  ;;  %v376_v62 = vrot.slane %v367_v59, %v375_v60 }
  0x48   : > { %444 = vmatmul.mubr.f32.vlgmr.msra.gmra.mrb[0].mxu1 %v231_v2 }
  0x49   : > { %521 = vmatmul.mubr.f32.vlgmr.msra.gmra.mrb[0].mxu0 %v233_v3  ;;  %449 = vmatprep.mubr.f32.mxu1 %v236_v4 }
  0x4a   : > { %526 = vmatprep.mubr.f32.mxu0 %v238_v5  ;;  %969 = vmatpush3.bf16.msra.mxu0 %v968_v13 }
  0x4b   : > { %1006 = vmatpush3.bf16.msra.mxu1 %v968_v13  ;;  %971 = vmatprep.subr.bf16.mxu0 %v970_v16 }
  0x4c   : > { %450 = vmatmul.mubr.f32.gmra.mrb[2].mxu1 %v235_v6  ;;  %999 = vmatprep.subr.bf16.mxu1 %v970_v16 }
  0x4d   : > { %527 = vmatmul.mubr.f32.gmra.mrb[2].mxu0 %v237_v7 }
  0x4e   : > { %973 = vmatpush3.bf16.msra.mxu0 %v972_v19 }
  0x4f   : > { %1007 = vmatpush3.bf16.msra.mxu1 %v972_v19  ;;  %975 = vmatprep.subr.bf16.mxu0 %v974_v22 }
  0x50   : > { %1000 = vmatprep.subr.bf16.mxu1 %v974_v22 }
  0x52   : > { %977 = vmatpush3.bf16.msra.mxu0 %v976_v25 }
  0x53   : > { %1008 = vmatpush3.bf16.msra.mxu1 %v976_v25  ;;  %979 = vmatprep.subr.bf16.mxu0 %v978_v28 }
  0x54   : > { %1001 = vmatprep.subr.bf16.mxu1 %v978_v28 }
  0x56   : > { %981 = vmatpush3.bf16.msra.mxu0 %v980_v31 }
  0x57   : > { %1009 = vmatpush3.bf16.msra.mxu1 %v980_v31  ;;  %983 = vmatprep.subr.bf16.mxu0 %v982_v34 }
  0x58   : > { %1002 = vmatprep.subr.bf16.mxu1 %v982_v34 }
  0x5a   : > { %985 = vmatpush3.bf16.msra.mxu0 %v984_v37 }
  0x5b   : > { %1010 = vmatpush3.bf16.msra.mxu1 %v984_v37  ;;  %987 = vmatprep.subr.bf16.mxu0 %v986_v40 }
  0x5c   : > { %1003 = vmatprep.subr.bf16.mxu1 %v986_v40 }
  0x5e   : > { %989 = vmatpush3.bf16.msra.mxu0 %v988_v43 }
  0x5f   : > { %1011 = vmatpush3.bf16.msra.mxu1 %v988_v43  ;;  %991 = vmatprep.subr.bf16.mxu0 %v990_v46 }
  0x60   : > { %1004 = vmatprep.subr.bf16.mxu1 %v990_v46 }
  0x62   : > { %993 = vmatpush3.bf16.msra.mxu0 %v992_v49 }
  0x63   : > { %1012 = vmatpush3.bf16.msra.mxu1 %v992_v49  ;;  %995 = vmatprep.subr.bf16.mxu0 %v994_v52 }
  0x64   : > { %1005 = vmatprep.subr.bf16.mxu1 %v994_v52 }
  0x66   : > { %997 = vmatpush3.bf16.msra.mxu0 %v996_v55 }
  0x67   : > { %1013 = vmatpush3.bf16.msra.mxu1 %v996_v55 }
 0x11b   : > { %v445_v63 = vpop.f32.mrb[0].mxu1 }
 0x11c   : > { %v446_v0 = vadd.f32 %v445_v63, %v372_v61  ;;  %v447_v1 = vpop.f32.mrb[1].mxu1  ;;  %v522_v2 = vpop.f32.mrb[0].mxu0 }
 0x11d   : > { %v448_v3 = vadd.f32 %v447_v1, %v376_v62  ;;  %v524_v4 = vpop.f32.mrb[1].mxu0 }
 0x11e   : > { %v1594_v5 = vadd.f32 %v522_v2, %v446_v0 }
 0x11f   : > { %v1596_v6 = vadd.f32 %v524_v4, %v448_v3  ;;  %v451_v7 = vpop.f32.mrb[2].mxu1 }
 0x120   : > { %v545_v8 = vand.u32 2147483647, %v1594_v5  ;;  %v452_v9 = vadd.f32 %v451_v7, %v372_v61  ;;  %v453_v10 = vpop.f32.mrb[3].mxu1  ;;  %v528_v11 = vpop.f32.mrb[2].mxu0  ;;  %v533_v44 = vmax.f32 %v1594_v5, 0.0  ;;  %vm537_vm2 = vcmp.ne.f32.partialorder %v1594_v5, %v1594_v5 }
 0x121   : > { %v546_v12 = vand.u32 2147483647, %v1596_v6  ;;  %v454_v13 = vadd.f32 %v453_v10, %v376_v62  ;;  %v530_v14 = vpop.f32.mrb[3].mxu0  ;;  %v534_v54 = vmax.f32 %v1596_v6, 0.0  ;;  %vm538_vm3 = vcmp.ne.f32.partialorder %v1596_v6, %v1596_v6 }
 0x122   : > { %v549_v15 = vsub.f32 0.0, %v545_v8  ;;  %v1600_v16 = vadd.f32 %v528_v11, %v452_v9 }
 0x123   : > { %v550_v17 = vsub.f32 0.0, %v546_v12  ;;  %v1602_v18 = vadd.f32 %v530_v14, %v454_v13 }
 0x124   : > { %v553_v19 = vmul.f32 1.442695, %v549_v15  ;;  %v547_v20 = vand.u32 2147483647, %v1600_v16  ;;  %v535_v60 = vmax.f32 %v1600_v16, 0.0  ;;  %vm539_vm6 = vcmp.ne.f32.partialorder %v1600_v16, %v1600_v16 }
 0x125   : > { %v555_v21 = vmul.f32 1.442695, %v550_v17  ;;  %v548_v22 = vand.u32 2147483647, %v1602_v18  ;;  %v536_v4 = vmax.f32 %v1602_v18, 0.0  ;;  %vm540_vm7 = vcmp.ne.f32.partialorder %v1602_v18, %v1602_v18 }
 0x126   : > { %1030 = vpow2.f32 %v553_v19  ;;  %v551_v23 = vsub.f32 0.0, %v547_v20  ;;  %v796_v17 = vld [vmem:[%s1636_s4] ss:$0 sm:$0xff] }
 0x127   : > { %1032 = vpow2.f32 %v555_v21  ;;  %v552_v24 = vsub.f32 0.0, %v548_v22 }
 0x128   : > { %v557_v25 = vmul.f32 1.442695, %v551_v23 }
 0x129   : > { %v559_v26 = vmul.f32 1.442695, %v552_v24 }
 0x12a   : > { %1034 = vpow2.f32 %v557_v25 }
 0x12b   : > { %1036 = vpow2.f32 %v559_v26 }
 0x130   : > { %v1031_v27 = vpop.eup %1030 }
 0x131   : > { %v1033_v28 = vpop.eup %1032  ;;  %v561_v29 = vadd.f32 1.0, %v1031_v27  ;;  %v564_v34 = vmul.f32 -0.5, %v1031_v27  ;;  %v567_v38 = vand.u32 2147483647, %v1031_v27 }
 0x132   : > { %v570_v30 = vadd.f32 1.0, %v1033_v28  ;;  %v573_v36 = vmul.f32 -0.5, %v1033_v28  ;;  %v576_v42 = vand.u32 2147483647, %v1033_v28 }
 0x133   : > { %1038 = vlog2.f32 %v561_v29  ;;  %v565_v37 = vadd.f32 1.0, %v564_v34  ;;  %vm568_vm0 = vcmp.lt.f32.partialorder %v567_v38, 0.0004427343 }
 0x134   : > { %v1035_v31 = vpop.eup %1034  ;;  %1040 = vlog2.f32 %v570_v30  ;;  %v574_v40 = vadd.f32 1.0, %v573_v36  ;;  %vm577_vm1 = vcmp.lt.f32.partialorder %v576_v42, 0.0004427343 }
 0x135   : > { %v1037_v32 = vpop.eup %1036  ;;  %v579_v33 = vadd.f32 1.0, %v1035_v31  ;;  %v582_v39 = vmul.f32 -0.5, %v1035_v31  ;;  %v566_v47 = vmul.f32 %v1031_v27, %v565_v37  ;;  %v585_v49 = vand.u32 2147483647, %v1035_v31 }
 0x136   : > { %v588_v35 = vadd.f32 1.0, %v1037_v32  ;;  %v591_v41 = vmul.f32 -0.5, %v1037_v32  ;;  %v575_v51 = vmul.f32 %v1033_v28, %v574_v40  ;;  %v594_v55 = vand.u32 2147483647, %v1037_v32 }
 0x137   : > { %1042 = vlog2.f32 %v579_v33  ;;  %v583_v48 = vadd.f32 1.0, %v582_v39  ;;  %vm586_vm4 = vcmp.lt.f32.partialorder %v585_v49, 0.0004427343 }
 0x138   : > { %1044 = vlog2.f32 %v588_v35  ;;  %v592_v52 = vadd.f32 1.0, %v591_v41  ;;  %vm595_vm5 = vcmp.lt.f32.partialorder %v594_v55, 0.0004427343 }
 0x139   : > { %v584_v62 = vmul.f32 %v1035_v31, %v583_v48 }
 0x13a   : > { %v593_v2 = vmul.f32 %v1037_v32, %v592_v52 }
 0x13d   : > { %v1039_v43 = vpop.eup %1038 }
 0x13e   : > { %v1041_v45 = vpop.eup %1040  ;;  %v563_v46 = vmul.f32 0.6931472, %v1039_v43 }
 0x13f   : > { %v572_v50 = vmul.f32 0.6931472, %v1041_v45 }
 0x140   : > { %v569_v53 = vsel %vm568_vm0, %v566_v47, %v563_v46 }
 0x141   : > { %v1043_v56 = vpop.eup %1042  ;;  %v597_v57 = vadd.f32 %v569_v53, %v533_v44  ;;  %v578_v58 = vsel %vm577_vm1, %v575_v51, %v572_v50 }
 0x142   : > { %v1045_v59 = vpop.eup %1044  ;;  %v581_v61 = vmul.f32 0.6931472, %v1043_v56  ;;  %v598_v63 = vadd.f32 %v578_v58, %v534_v54 }
 0x143   : > { %v601_v0 = vsel %vm537_vm2, %v1594_v5, %v597_v57  ;;  %v590_v1 = vmul.f32 0.6931472, %v1045_v59 }
 0x144   : > { %v587_v3 = vsel %vm586_vm4, %v584_v62, %v581_v61  ;;  %v602_v7 = vsel %vm538_vm3, %v1596_v6, %v598_v63  ;;  %v792_v11 = vadd.f32 -0.6931472, %v601_v0 }
 0x145   : > { %v599_v8 = vadd.f32 %v587_v3, %v535_v60  ;;  %v793_v9 = vadd.f32 -0.6931472, %v602_v7  ;;  %v596_v10 = vsel %vm595_vm5, %v593_v2, %v590_v1 }
 0x146   : > { %v600_v12 = vadd.f32 %v596_v10, %v536_v4 }
 0x147   : > { %v603_v5 = vsel %vm539_vm6, %v1600_v16, %v599_v8  ;;  %712 = vmatprep.mubr.f32.mxu0 %v793_v9 }
 0x148   : > { %713 = vmatmul.mubr.f32.vlgmr.msra.gmra.mrb[4].mxu0 %v792_v11  ;;  %v604_v13 = vsel %vm540_vm7, %v1602_v18, %v600_v12  ;;  %v794_v14 = vadd.f32 -0.6931472, %v603_v5 }
 0x149   : > { %v795_v6 = vadd.f32 -0.6931472, %v604_v13 }
 0x14b   : > { %717 = vmatprep.mubr.f32.mxu1 %v795_v6 }
 0x14c   : > { %718 = vmatmul.mubr.f32.vlgmr.msra.gmra.mrb[4].mxu1 %v794_v14 }
 0x21b   : > { %v832_v15 = vpop.f32.mrb[4].mxu0 }
 0x21c   : > { %v833_v19 = vpop.f32.mrb[5].mxu0 }
 0x21d   : > { %v834_v20 = vadd.f32 %v833_v19, %v832_v15 }
 0x21f   : > { %v715_v16 = vadd.f32 %v834_v20, %v796_v17  ;;  %v835_v21 = vpop.f32.mrb[4].mxu1 }
 0x220   : > { %v836_v18 = vpop.f32.mrb[5].mxu1 }
 0x221   : > { %724 = vst.msk [vmem:[%s229_s8] sm:$0xff] %vm723_vm8, %v715_v16  ;;  %v837_v22 = vadd.f32 %v836_v18, %v835_v21 }
 0x223   : > { %v720_v23 = vadd.f32 %v837_v22, %v796_v17 }
 0x225   : > { %725 = vst.msk [vmem:[%s229_s8 + $0x8] sm:$0xff] %vm723_vm8, %v720_v23 }
 0x226 PF: > { %s15_s18 = sadd.s32 1, %s1052_s18  }
 0x227   : > { %p12_p4 = scmp.ge.s32.totalorder %s15_s18, 4  }
 0x229   :  { %14 = sbr.rel (!%p12_p4) target bundleno = 1 (0x1), region = 70 }

</bundles_post_ra>
